<compile_context>
chip_gen: v5e
topology: v5e:2x2
jax: 0.10.0
libtpu: 0.0.40
codegen_flags: <defaults>
</compile_context>

<pallas_src>
import functools

import numpy as np
import jax
import jax.numpy as jnp
from jax.experimental import pallas as pl
from jax.experimental.pallas import tpu as pltpu


# ----------------------------------------------------------------------------
# Pallas kernel: per-(batch, W-tile) upsample + disp/depth math + partial sum
# ----------------------------------------------------------------------------
def _sf_eval_kernel(fx_ref, x_ref, wy_ref, wxt_ref, mask_ref, out_ref, *, h):
    b = pl.program_id(0)          # batch index
    c = fx_ref[b] * 0.54          # hoisted scalar (SMEM, f32)

    x = x_ref[...]                # (2h, w)      bf16: rows [0:h]=disp*W, [h:2h]=sf z
    wxt = wxt_ref[...]            # (w, tile_w)  bf16 column-interp tile (zero-padded cols)
    wy = wy_ref[...]              # (Hp, h)      bf16 row-interp matrix (zero-padded rows)

    # cols-first association, both planes fused into one MXU call:
    #   (2h, w) @ (w, tile_w) -> (2h, tile_w), f32 accumulate.
    y = jnp.dot(x, wxt, preferred_element_type=jnp.float32)
    d_lr = y[:h].astype(jnp.bfloat16)      # disparity half   (h, tile_w)
    s_lr = y[h:].astype(jnp.bfloat16)      # scene-flow-z half

    # (Hp, h) @ (h, tile_w) -> full-res tiles, f32 accumulate.
    disp_up = jnp.dot(wy, d_lr, preferred_element_type=jnp.float32)   # already * W
    sfz_up = jnp.dot(wy, s_lr, preferred_element_type=jnp.float32)

    # _disp2depth_kitti_K + clamp   (approx reciprocal -> EUP slot)
    denom = jnp.where(disp_up > 0.0, disp_up, 1.0)
    depth = jnp.clip(c * pl.reciprocal(denom, approx=True), 0.001, 80.0)

    # _depth2disp_kitti_K on next-frame depth:  disp_next = c / (depth + sfz_up).
    # Padded rows/cols are zeroed by the precomputed mask; the scalar c is
    # factored out of the reduction.
    inv_next = pl.reciprocal(depth + sfz_up, approx=True)
    partial = c * jnp.sum(inv_next * mask_ref[...])

    out_ref[...] = jnp.full((1, 1), partial, dtype=jnp.float32)


# ----------------------------------------------------------------------------
# align_corners=True bilinear interpolation matrix (numpy, trace-time constant)
# ----------------------------------------------------------------------------
def _interp_matrix_np(out_size, in_size):
    if in_size == 1:
        return np.ones((out_size, 1), np.float32)
    if out_size == 1:
        pos = np.zeros((1,), np.float64)
    else:
        pos = np.arange(out_size, dtype=np.float64) * (in_size - 1) / (out_size - 1)
    lo = np.clip(np.floor(pos).astype(np.int64), 0, in_size - 2)
    frac = (pos - lo).astype(np.float32)
    cols = np.arange(in_size)[None, :]
    m = (cols == lo[:, None]).astype(np.float32) * (1.0 - frac)[:, None] \
        + (cols == (lo + 1)[:, None]).astype(np.float32) * frac[:, None]
    return m.astype(np.float32)


def _round_up(x, m):
    return ((x + m - 1) // m) * m


@functools.lru_cache(maxsize=8)
def _build_constants(H, W, h, w):
    """Static (per-shape) interp matrices, padding mask and tiling choices."""
    Hp = _round_up(H, 16)
    Wp = _round_up(W, 128)
    # Largest tile_w (multiple of 128, <= 1024) that divides Wp -> minimal
    # padded VALU work and a robust choice for any W (e.g. KITTI 1242 -> 640x2).
    tile_w = max(t for t in range(128, min(1024, Wp) + 1, 128) if Wp % t == 0)

    wy = _interp_matrix_np(H, h)                                    # (H, h)
    wy_p = np.zeros((Hp, h), np.float32)
    wy_p[:H] = wy
    wxt = _interp_matrix_np(W, w).T                                 # (w, W)
    wxt_p = np.zeros((w, Wp), np.float32)
    wxt_p[:, :W] = wxt
    mask = np.zeros((Hp, Wp), np.float32)
    mask[:H, :W] = 1.0

    return (jnp.asarray(wy_p, dtype=jnp.bfloat16),
            jnp.asarray(wxt_p, dtype=jnp.bfloat16),
            jnp.asarray(mask, dtype=jnp.float32),
            Hp, Wp, tile_w)


# ----------------------------------------------------------------------------
# Wrapper mirroring Eval_SceneFlow_KITTI_Test.forward -> loss_dict
# ----------------------------------------------------------------------------
def eval_sceneflow_kitti_test(output_dict, target_dict):
    input_l1 = target_dict["input_l1"]            # [B, 3, H, W]   (NCHW)
    intrinsics = target_dict["input_k_l1"]        # [B, 3, 3]
    disp_lr = output_dict["disp_l1_pp"][0]        # [B, 1, h, w]
    flow_lr = output_dict["flow_f_pp"][0]         # [B, 3, h, w]

    B, _, H, W = input_l1.shape
    h, w = disp_lr.shape[2], disp_lr.shape[3]

    wy_p, wxt_p, mask, Hp, Wp, tile_w = _build_constants(int(H), int(W), int(h), int(w))
    n_wt = Wp // tile_w

    fx = intrinsics[:, 0, 0].astype(jnp.float32)                      # [B]

    # Low-res planes: fold the `* W` scale into the (cheap) low-res disparity,
    # stack [disp*W ; sf_z] along rows so one matmul handles both planes.
    disp2d = disp_lr[:, 0].astype(jnp.float32) * float(W)             # (B, h, w)
    sfz2d = flow_lr[:, 2].astype(jnp.float32)                         # (B, h, w)
    stacked = jnp.concatenate([disp2d, sfz2d], axis=1).astype(jnp.bfloat16)  # (B, 2h, w)

    partials = pl.pallas_call(
        functools.partial(_sf_eval_kernel, h=h),
        out_shape=jax.ShapeDtypeStruct((B, n_wt, 1, 1), jnp.float32),
        grid_spec=pltpu.PrefetchScalarGridSpec(
            num_scalar_prefetch=0,
            grid=(B, n_wt),
            in_specs=[
                pl.BlockSpec(memory_space=pltpu.MemorySpace.SMEM),          # fx [B]
                pl.BlockSpec((None, 2 * h, w), lambda b, j: (b, 0, 0)),     # stacked lr planes
                pl.BlockSpec((Hp, h), lambda b, j: (0, 0)),                 # Wy (padded)
                pl.BlockSpec((w, tile_w), lambda b, j: (0, j)),             # WxT column tile
                pl.BlockSpec((Hp, tile_w), lambda b, j: (0, j)),            # 0/1 valid mask tile
            ],
            out_specs=pl.BlockSpec((None, None, 1, 1), lambda b, j: (b, j, 0, 0)),
        ),
        compiler_params=pltpu.CompilerParams(
            dimension_semantics=("parallel", "parallel"),
            vmem_limit_bytes=32 * 1024 * 1024,
        ),
    )(fx, stacked, wy_p, wxt_p, mask)

    return {"sf": jnp.sum(partials)}


# Pure-JAX f32 reference for validation (mirrors the PyTorch module).
def _reference(output_dict, target_dict):
    input_l1 = target_dict["input_l1"]
    B, _, H, W = input_l1.shape
    fx = target_dict["input_k_l1"][:, 0, 0].astype(jnp.float32)
    disp2d = output_dict["disp_l1_pp"][0][:, 0].astype(jnp.float32)
    sfz2d = output_dict["flow_f_pp"][0][:, 2].astype(jnp.float32)
    h, w = disp2d.shape[1], disp2d.shape[2]
    wy = jnp.asarray(_interp_matrix_np(H, h))
    wxt = jnp.asarray(_interp_matrix_np(W, w).T)
    disp_up = jnp.einsum("Hh,bhw,wW->bHW", wy, disp2d, wxt) * float(W)
    mask = (disp_up > 0.0).astype(jnp.float32)
    depth = fx[:, None, None] * 0.54 / (disp_up + (1.0 - mask))
    depth = jnp.clip(depth, 0.001, 80.0)
    sfz_up = jnp.einsum("Hh,bhw,wW->bHW", wy, sfz2d, wxt)
    disp_next = fx[:, None, None] * 0.54 / (depth + sfz_up)
    return disp_next.sum()


if __name__ == "__main__":
    key = jax.random.PRNGKey(0)
    k1, k2, k3 = jax.random.split(key, 3)

    B, H, W = 2, 16, 32          # full resolution (input_l1)
    h, w = 8, 16                 # network output resolution

    input_l1 = jax.random.uniform(k1, (B, 3, H, W), jnp.float32)
    # intrinsics: fx on the [0,0] entry, rest arbitrary deterministic values
    intrinsics = jnp.tile(jnp.eye(3, dtype=jnp.float32)[None], (B, 1, 1))
    intrinsics = intrinsics.at[:, 0, 0].set(jnp.array([7.2, 8.5], jnp.float32))

    disp_pred = jax.random.uniform(k2, (B, 1, h, w), jnp.float32,
                                   minval=0.05, maxval=0.3)
    flow_pred = 0.1 * jax.random.normal(k3, (B, 3, h, w), jnp.float32)

    target_dict = {"input_l1": input_l1, "input_k_l1": intrinsics}
    output_dict = {"disp_l1_pp": [disp_pred], "flow_f_pp": [flow_pred]}

    loss_dict = eval_sceneflow_kitti_test(output_dict, target_dict)
    sf = jax.block_until_ready(loss_dict["sf"])

    ref = jax.block_until_ready(_reference(output_dict, target_dict))
    # bf16 MXU matmuls + approx reciprocals perturb the sum slightly (<1% rel).
    assert jnp.allclose(sf, ref, rtol=3e-2, atol=1e-2), (sf, ref)

    print("KERNEL_OK")
</pallas_src>

<mosaic_0001>
module attributes {stable_mosaic.version = 11 : i64} {
  func.func @_sf_eval_kernel(%arg0: i32, %arg1: i32, %arg2: memref<2xf32, #tpu.memory_space<smem>>, %arg3: memref<1x16x16xbf16, #tpu.memory_space<vmem>>, %arg4: memref<16x8xbf16, #tpu.memory_space<vmem>>, %arg5: memref<16x128xbf16, #tpu.memory_space<vmem>>, %arg6: memref<16x128xf32, #tpu.memory_space<vmem>>, %arg7: memref<1x1x1x1xf32, #tpu.memory_space<vmem>>) attributes {dimension_semantics = [#tpu.dimension_semantics<parallel>, #tpu.dimension_semantics<parallel>], iteration_bounds = array<i64: 2, 1>, scalar_prefetch = 0 : i64, scratch_operands = 0 : i64, tpu.core_type = #tpu.core_type<tc>, window_params = [{transform_indices = @transform_0, window_bounds = array<i64: 2>}, {transform_indices = @transform_1, window_bounds = array<i64: 1, 16, 16>}, {pipeline_mode = #tpu.pipeline_mode<synchronous>, transform_indices = @transform_2, window_bounds = array<i64: 16, 8>}, {transform_indices = @transform_3, window_bounds = array<i64: 16, 128>}, {transform_indices = @transform_4, window_bounds = array<i64: 16, 128>}, {transform_indices = @transform_5, window_bounds = array<i64: 1, 1, 1, 1>}]} {
    %0 = arith.index_cast %arg0 : i32 to index
    %1 = memref.load %arg2[%0] : memref<2xf32, #tpu.memory_space<smem>>
    %cst = arith.constant 5.400000e-01 : f32
    %2 = arith.mulf %1, %cst : f32
    %c0 = arith.constant 0 : index
    %c0_0 = arith.constant 0 : index
    %c0_1 = arith.constant 0 : index
    %3 = vector.load %arg3[%c0, %c0_0, %c0_1] : memref<1x16x16xbf16, #tpu.memory_space<vmem>>, vector<1x16x16xbf16>
    %4 = vector.shape_cast %3 : vector<1x16x16xbf16> to vector<16x16xbf16>
    %c0_2 = arith.constant 0 : index
    %c0_3 = arith.constant 0 : index
    %5 = vector.load %arg5[%c0_2, %c0_3] : memref<16x128xbf16, #tpu.memory_space<vmem>>, vector<16x128xbf16>
    %c0_4 = arith.constant 0 : index
    %c0_5 = arith.constant 0 : index
    %6 = vector.load %arg4[%c0_4, %c0_5] : memref<16x8xbf16, #tpu.memory_space<vmem>>, vector<16x8xbf16>
    %cst_6 = arith.constant dense<0.000000e+00> : vector<16x128xf32>
    %7 = tpu.matmul %4, %5, %cst_6 {dimension_numbers = #tpu.dot_dimension_numbers<[1], [0], [0], [1], [0, 0, 1, 1], [], []>} : vector<16x16xbf16>, vector<16x128xbf16>, vector<16x128xf32> -> vector<16x128xf32>
    %8 = vector.extract_strided_slice %7 {offsets = [0, 0], sizes = [8, 128], strides = [1, 1]} : vector<16x128xf32> to vector<8x128xf32>
    %9 = arith.truncf %8 : vector<8x128xf32> to vector<8x128xbf16>
    %10 = vector.extract_strided_slice %7 {offsets = [8, 0], sizes = [8, 128], strides = [1, 1]} : vector<16x128xf32> to vector<8x128xf32>
    %11 = arith.truncf %10 : vector<8x128xf32> to vector<8x128xbf16>
    %cst_7 = arith.constant dense<0.000000e+00> : vector<16x128xf32>
    %12 = tpu.matmul %6, %9, %cst_7 {dimension_numbers = #tpu.dot_dimension_numbers<[1], [0], [0], [1], [0, 0, 1, 1], [], []>} : vector<16x8xbf16>, vector<8x128xbf16>, vector<16x128xf32> -> vector<16x128xf32>
    %cst_8 = arith.constant dense<0.000000e+00> : vector<16x128xf32>
    %13 = tpu.matmul %6, %11, %cst_8 {dimension_numbers = #tpu.dot_dimension_numbers<[1], [0], [0], [1], [0, 0, 1, 1], [], []>} : vector<16x8xbf16>, vector<8x128xbf16>, vector<16x128xf32> -> vector<16x128xf32>
    %cst_9 = arith.constant 0.000000e+00 : f32
    %14 = vector.broadcast %cst_9 : f32 to vector<16x128xf32>
    %15 = arith.cmpf ogt, %12, %14 : vector<16x128xf32>
    %cst_10 = arith.constant 1.000000e+00 : f32
    %16 = vector.broadcast %cst_10 : f32 to vector<16x128xf32>
    %17 = arith.select %15, %12, %16 : vector<16x128xi1>, vector<16x128xf32>
    %18 = tpu.reciprocal %17 {approx = true} : vector<16x128xf32> -> vector<16x128xf32>
    %19 = vector.broadcast %2 : f32 to vector<16x128xf32>
    %20 = arith.mulf %19, %18 : vector<16x128xf32>
    %cst_11 = arith.constant 1.000000e-03 : f32
    %cst_12 = arith.constant 8.000000e+01 : f32
    %21 = vector.broadcast %cst_11 : f32 to vector<16x128xf32>
    %22 = arith.maximumf %21, %20 : vector<16x128xf32>
    %23 = vector.broadcast %cst_12 : f32 to vector<16x128xf32>
    %24 = arith.minimumf %23, %22 : vector<16x128xf32>
    %25 = arith.addf %24, %13 : vector<16x128xf32>
    %26 = tpu.reciprocal %25 {approx = true} : vector<16x128xf32> -> vector<16x128xf32>
    %c0_13 = arith.constant 0 : index
    %c0_14 = arith.constant 0 : index
    %27 = vector.load %arg6[%c0_13, %c0_14] : memref<16x128xf32, #tpu.memory_space<vmem>>, vector<16x128xf32>
    %28 = arith.mulf %26, %27 : vector<16x128xf32>
    %29 = vector.shape_cast %28 : vector<16x128xf32> to vector<1x16x128xf32>
    %cst_15 = arith.constant dense<0.000000e+00> : vector<1xf32>
    %30 = vector.multi_reduction <add>, %29, %cst_15 [1, 2] : vector<1x16x128xf32> to vector<1xf32>
    %31 = vector.shape_cast %30 : vector<1xf32> to vector<1x1x1xf32>
    %32 = vector.extract %31[0, 0, 0] : f32 from vector<1x1x1xf32>
    %33 = arith.mulf %2, %32 : f32
    %34 = vector.broadcast %33 : f32 to vector<1x1xf32>
    %c0_16 = arith.constant 0 : index
    %c0_17 = arith.constant 0 : index
    %c0_18 = arith.constant 0 : index
    %c0_19 = arith.constant 0 : index
    %35 = vector.load %arg7[%c0_16, %c0_17, %c0_18, %c0_19] : memref<1x1x1x1xf32, #tpu.memory_space<vmem>>, vector<1x1x1x1xf32>
    %36 = vector.shape_cast %35 : vector<1x1x1x1xf32> to vector<1x1xf32>
    %37 = vector.shape_cast %34 : vector<1x1xf32> to vector<1x1x1x1xf32>
    tpu.vector_store %arg7[%c0_16, %c0_17, %c0_18, %c0_19], %37 {strides = array<i32>} : memref<1x1x1x1xf32, #tpu.memory_space<vmem>>, vector<1x1x1x1xf32>,
    return
  }
  func.func @transform_0(%arg0: i32, %arg1: i32) -> i32 {
    %c0_i32 = arith.constant 0 : i32
    %c0_i32_0 = arith.constant 0 : i32
    return %c0_i32 : i32
  }
  func.func @transform_1(%arg0: i32, %arg1: i32) -> (i32, i32, i32) {
    %c0_i32 = arith.constant 0 : i32
    %c0_i32_0 = arith.constant 0 : i32
    %c0_i32_1 = arith.constant 0 : i32
    return %arg0, %c0_i32, %c0_i32_0 : i32, i32, i32
  }
  func.func @transform_2(%arg0: i32, %arg1: i32) -> (i32, i32) {
    %c0_i32 = arith.constant 0 : i32
    %c0_i32_0 = arith.constant 0 : i32
    %c0_i32_1 = arith.constant 0 : i32
    return %c0_i32, %c0_i32_0 : i32, i32
  }
  func.func @transform_3(%arg0: i32, %arg1: i32) -> (i32, i32) {
    %c0_i32 = arith.constant 0 : i32
    %c0_i32_0 = arith.constant 0 : i32
    return %c0_i32, %arg1 : i32, i32
  }
  func.func @transform_4(%arg0: i32, %arg1: i32) -> (i32, i32) {
    %c0_i32 = arith.constant 0 : i32
    %c0_i32_0 = arith.constant 0 : i32
    return %c0_i32, %arg1 : i32, i32
  }
  func.func @transform_5(%arg0: i32, %arg1: i32) -> (i32, i32, i32, i32) {
    %c0_i32 = arith.constant 0 : i32
    %c0_i32_0 = arith.constant 0 : i32
    %c0_i32_1 = arith.constant 0 : i32
    return %arg0, %arg1, %c0_i32, %c0_i32_0 : i32, i32, i32, i32
  }
}

</mosaic_0001>

<bundles_post_ra>
// kernel: tpu_custom_call.1
= control target key start
LH: loop header
LB: loop body
LE: loop exit
PB: predicated region body
PF: predicated region fallthrough
CT: control target
= control target key end

     0   :  { %10 = vsyncpa [#allocation4], 0  ;;  %s983_s0 = inlined_call_operand.vmem [shape: f32[2], index: 0, kind: input, shape index: {}]   ;;  %s984_s1 = inlined_call_operand.hbm [shape: bf16[2,16,16], index: 1, kind: input, shape index: {}]   ;;  %s985_s2 = inlined_call_operand.vmem [shape: bf16[16,8], index: 2, kind: input, shape index: {}]   ;;  %s986_s3 = inlined_call_operand.vmem [shape: bf16[16,128], index: 3, kind: input, shape index: {}]   ;;  %s987_s4 = inlined_call_operand.hbm [shape: f32[16,128], index: 4, kind: input, shape index: {}]   ;;  %s988_s5 = inlined_call_operand.vmem [shape: f32[2,1,1,1], index: 5, kind: output, shape index: {}]  }
   0x1   :  { %11 = vsyncpa [#allocation3], 0 }
   0x2   :  { %13 = vsyncpa [#allocation3 + $0x1], 0 }
   0x3   :  { %14 = vsyncpa [#allocation7], 0  ;;  %s849_s18 = smov 0   ;;  %s851_s19 = smov 0  }
   0x4   :  { %s853_s20 = smov 0   ;;  %s855_s21 = smov 0  }
   0x5   :  { %s857_s22 = smov 0   ;;  %s859_s23 = smov 0  }
   0x6 LB: > { %s553_s24 = sadd.s32 4294967295, %s811_s23   ;;  %s60_s25 = sadd.s32 1, %s799_s20  ;;  %s811_s23 = sphi %s859_s23, %s20_s23   ;;  %s807_s22 = sphi %s857_s22, %s997_s22   ;;  %s803_s21 = sphi %s855_s21, %s996_s21   ;;  %s799_s20 = sphi %s853_s20, %s995_s20   ;;  %s795_s19 = sphi %s851_s19, %s994_s19   ;;  %s791_s18 = sphi %s849_s18, %s993_s18  }
   0x7   : > { %p67_p0 = scmp.ne.s32.totalorder %s799_s20, %s795_s19  ;;  %p68_p1 = scmp.eq.s32.totalorder %s811_s23, 0 }
   0x8   : > { %p73_p2 = scmp.ne.s32.totalorder %s795_s19, %s791_s18  ;;  %p883_p3 = scmp.eq.s32.totalorder %s553_s24, 0 }
   0x9   : > { %p69_p4 = por %p68_p1, %p67_p0  ;;  %p555_p5 = scmp.ge.s32.totalorder %s811_s23, 1 }
   0xa   : > { %p890_p6 = por %p883_p3, %p73_p2  ;;  %p185_p7 = scmp.lt.s32.totalorder %s811_s23, 3 }
   0xb   : > { %s197_s30 = sshll.u32 %s983_s0, 4  ;;  %p613_p10 = scmp.lt.s32.totalorder %s811_s23, 2  ;;  %s198_s30 = int_to_ptr.vmem [resolvable:$true] %s197_s30 }
   0xc   : > { %p898_p8 = pnand %p555_p5, %p185_p7  ;;  %s218_s9 = sshll.u32 %s987_s4, 4  ;;  %s219_s9 = int_to_ptr.hbm [resolvable:$true] %s218_s9 }
   0xd   : > { %p910_p12 = pnand %p613_p10, %p69_p4  ;;  %s813_s11 = smov [#allocation6]  }
   0xe   : > { %p600_p9 = pneg %p898_p8  ;;  %s220_s12 = sshll.u32 %s813_s11, 4  ;;  %s221_s12 = int_to_ptr.vmem [resolvable:$true] %s220_s12 }
   0xf   : > { %s814_s13 = smov [#allocation2]   ;;  %s815_s14 = smov 128  }
  0x10   : > { %p601_p11 = pnand %p600_p9, %p883_p3  ;;  %s816_s15 = smov 8  }
  0x11   : > { %s234_s16 = sand.u32 1, %s799_s20   ;;  %s32_s17 = sadd.s32 1, %s807_s22 }
  0x12   : > { %603 = dma.vmem_to_smem (!%p601_p11), %s198_s30, 16, %s814_s13, [#allocation4]  }
  0x13   : > { %606 = dma.hbm_to_vmem [thread:$0]  (!%p601_p11), %s219_s9, 256, %s221_s12, [#allocation7], %s815_s14, %s815_s14, %s816_s15  }
  0x14   : > { %p34_p13 = scmp.ge.s32.totalorder %s32_s17, 2  ;;  %s560_s18 = sshll.u32 %s234_s16, 3 }
  0x15   : > { %s584_s24 = sshll.u32 %s807_s22, 3  ;;  %s238_s30 = scalar_lea.vmem [#allocation5], %s560_s18 }
  0x16   : > { %s999_s17 = smov (%p34_p13, %s32_s17), 0  ;;  %s243_s7 = scalar_lea.hbm %s984_s1, %s584_s24 }
  0x17   : > { %s246_s8 = sshll.u32 %s238_s30, 4  ;;  %s57_s11 = ssub.s32 %s807_s22, %s999_s17  ;;  %s247_s8 = int_to_ptr.vmem [resolvable:$true] %s246_s8 }
  0x18   : > { %s244_s13 = sshll.u32 %s243_s7, 4  ;;  %p58_p0 = scmp.eq.s32.totalorder %s57_s11, 0  ;;  %s245_s13 = int_to_ptr.hbm [resolvable:$true] %s244_s13 }
  0x19   : > { %s235_s12 = scalar_lea.sflag [#allocation3], %s234_s16  ;;  %s817_s14 = smov 64  }
  0x1a   : > { %s927_s9 = scalar_select %p58_p0, %s799_s20, %s60_s25  }
  0x1b   : > { %s818_s15 = smov 4   ;;  %258 = sbr.rel (%p898_p8) target bundleno = 521 (0x209), region = 40 }
  0x1c   : > { %610 = dma.hbm_to_vmem [thread:$0]  (!%p910_p12), %s245_s13, 128, %s247_s8, %s235_s12, %s817_s14, %s817_s14, %s818_s15  }
  0x20   : > { %778 = dma.done.wait (%p883_p3), [#allocation4], 16  }
  0x21   : > { %780 = vsyncadd (%p883_p3), [#allocation4], 4294967280  ;;  %s265_s18 = sand.u32 1, %s795_s19  }
  0x22   : > { %s565_s24 = sshll.u32 %s265_s18, 3  ;;  %s266_s25 = scalar_lea.sflag [#allocation3], %s265_s18 }
  0x23   : > { %s269_s28 = scalar_lea.vmem [#allocation5], %s565_s24 }
  0x24   : > { %782 = dma.done.wait (%p890_p6), %s266_s25, 128  }
  0x25   : > { %784 = vsyncadd (%p890_p6), %s266_s25, 4294967168 }
  0x26   : > { %786 = dma.done.wait (%p883_p3), [#allocation7], 256  }
  0x27   : > { %788 = vsyncadd (%p883_p3), [#allocation7], 4294967040 }
  0x28   : > { %280 = sfence }
  0x29   : > { %v586_v0 = vld [vmem:[%s986_s3] sm:$0xff]  ;;  %vm338_vm0 = vcmask 130048   ;;  %vm367_vm1 = vcmask 1043456   ;;  %vm363_vm2 = vcmask 64512   ;;  %s953_s26 = sld [smem:[#allocation2 + %s803_s21]]  ;;  %v419_v27 = vld [vmem:[#allocation6] sm:$0xff] }
  0x2a   : > { %v585_v1 = vld [vmem:[%s269_s28] sm:$0xff]  ;;  %349 = vmatpush.bf16.msra.mxu0 %v586_v0  ;;  %v420_v28 = vld [vmem:[#allocation6 + $0x8] sm:$0xff]  ;;  %p312_p1 = scmp.lt.s32.totalorder %s803_s21, 1  ;;  %vm435_vm5 = vcmask 0  }
  0x2b   : > { %v587_v5 = vld [vmem:[%s985_s2] sm:$0xff] }
  0x2c   : > { %s1001_s21 = smov (!%p312_p1, %s803_s21), 1 }
  0x2d   : > { %575 = vmatmul.msk.bf16.vlgmr.msra.gmra.mxu0 %vm338_vm0, %v585_v1  ;;  %s317_s11 = scalar_lea.vmem %s988_s5, %s1001_s21 }
  0x2f   : > { %s320_s29 = smul.f32 0.54, %s953_s26 }
  0x31   : > { %v408_v11 = vstv %s320_s29 }
  0xaa   : > { %v351_v2 = vpop.f32.mrf.mxu0 }
  0xab   : > { %v356_v3 = vpack.c.bf16 %v351_v2, %v351_v2 }
  0xad   : > { %v369_v4 = vsel %vm367_vm1, %v356_v3, 0 }
  0xae   : > { %378 = vmatpush.bf16.msra.mxu1 %v369_v4 }
  0xb1   : > { %580 = vmatmul.msk.bf16.vlgmr.msra.gmra.mxu1 %vm363_vm2, %v587_v5 }
  0xb2   : > { %v353_v6 = vpop.f32.mrf.mxu0 }
  0xb3   : > { %v357_v7 = vpack.c.bf16 %v353_v6, %v353_v6 }
  0xb5   : > { %v386_v8 = vsel %vm367_vm1, %v357_v7, 0 }
  0xb6   : > { %395 = vmatpush.bf16.msra.mxu2 %v386_v8 }
  0xb9   : > { %581 = vmatmul.msk.bf16.vlgmr.msra.gmra.mxu2 %vm363_vm2, %v587_v5 }
 0x12e   : > { %v380_v9 = vpop.f32.mrf.mxu1 }
 0x12f   : > { %vm402_vm3 = vcmp.gt.f32.partialorder %v380_v9, 0.0 }
 0x130   : > { %v404_v10 = vsel %vm402_vm3, %v380_v9, 1.0 }
 0x131   : > { %670 = vrcp.f32 %v404_v10 }
 0x136   : > { %v382_v12 = vpop.f32.mrf.mxu1 }
 0x137   : > { %v671_v13 = vpop.eup %670  ;;  %vm403_vm4 = vcmp.gt.f32.partialorder %v382_v12, 0.0 }
 0x138   : > { %v405_v14 = vsel %vm403_vm4, %v382_v12, 1.0  ;;  %v409_v15 = vmul.f32 %v671_v13, %v408_v11 }
 0x139   : > { %672 = vrcp.f32 %v405_v14 }
 0x13a   : > { %v411_v16 = vmax.f32 %v409_v15, 0.001 }
 0x13c   : > { %v397_v17 = vpop.f32.mrf.mxu2  ;;  %v413_v18 = vmin.f32 %v411_v16, 80.0 }
 0x13e   : > { %v415_v21 = vadd.f32 %v413_v18, %v397_v17 }
 0x13f   : > { %v673_v19 = vpop.eup %672 }
 0x140   : > { %v410_v20 = vmul.f32 %v673_v19, %v408_v11  ;;  %674 = vrcp.f32 %v415_v21 }
 0x142   : > { %v412_v22 = vmax.f32 %v410_v20, 0.001 }
 0x144   : > { %v399_v23 = vpop.f32.mrf.mxu2  ;;  %v414_v24 = vmin.f32 %v412_v22, 80.0 }
 0x146   : > { %v416_v25 = vadd.f32 %v414_v24, %v399_v23  ;;  %v675_v26 = vpop.eup %674 }
 0x147   : > { %v421_v30 = vmul.f32 %v675_v26, %v419_v27 }
 0x148   : > { %676 = vrcp.f32 %v416_v25 }
 0x14e   : > { %v677_v29 = vpop.eup %676 }
 0x14f   : > { %v422_v31 = vmul.f32 %v677_v29, %v420_v28 }
 0x151   : > { %v423_v32 = vadd.f32 %v422_v31, %v421_v30 }
 0x153   : > { %424 = vadd.xlane.f32.xlu0 %v423_v32 }
 0x1c6   : > { %v425_v33 = vpop.xlane.xlu0 %424 }
 0x1c7   : > { %v426_v34 = vrot.slane %v425_v33, 4 }
 0x1c9   : > { %v427_v35 = vadd.f32 %v426_v34, %v425_v33 }
 0x1cb   : > { %v428_v36 = vrot.slane %v427_v35, 2 }
 0x1cd   : > { %v429_v37 = vadd.f32 %v428_v36, %v427_v35 }
 0x1cf   : > { %v430_v38 = vrot.slane %v429_v37, 1 }
 0x1d1   : > { %v431_v39 = vadd.f32 %v430_v38, %v429_v37 }
 0x1d3   : > { %588 = vpush %v431_v39 }
 0x204   : > { %s589_s7 = spop %588 }
 0x205   : > { %s433_s13 = smul.f32 %s589_s7, %s320_s29 }
 0x207   : > { %v434_v40 = vstv %s433_s13 }
 0x208   : > { %436 = vst.msk [vmem:[%s317_s11] sm:$0x1] %vm435_vm5, %v434_v40 }
 0x209 PF: > { %s20_s23 = sadd.s32 1, %s811_s23   ;;  %s993_s18 = smov %s795_s19 }
 0x20a   : > { %p17_p2 = scmp.ge.s32.totalorder %s20_s23, 4   ;;  %s994_s19 = smov %s799_s20 }
 0x20b   : > { %s995_s20 = smov %s927_s9  ;;  %s996_s21 = smov %s807_s22 }
 0x20c   : > { %s997_s22 = smov %s999_s17  ;;  %19 = sbr.rel (!%p17_p2) target bundleno = 6 (0x6), region = 93 }
 0x211   :  { %460 = vsyncpa [#allocation3], 1 }
 0x212   :  { %462 = vsyncpa [#allocation3 + $0x1], 1 }
 0x213   :  { %463 = vsyncpa [#allocation7], 1 }
 0x214   :  { %464 = vsyncpa [#allocation4], 1 }
 0x215   :  { %466 = vsyncpa [#allocation4 + $0x1], 1 }

</bundles_post_ra>
